<compile_context>
chip_gen: v5e
topology: v5e:2x2
jax: 0.10.0
libtpu: 0.0.40
codegen_flags: <defaults>
</compile_context>

<pallas_src>
import functools

import jax
import jax.numpy as jnp
import numpy as np
from jax.experimental import pallas as pl
from jax.experimental.pallas import tpu as pltpu


def _round_up(x, m):
    return ((x + m - 1) // m) * m


def _sublane_tile(dtype):
    # Minimum second-to-last-dim tile per dtype: 8 (f32), 16 (bf16), 32 (int8/fp8).
    return max(8, 32 // jnp.dtype(dtype).itemsize)


def _vmem_limit_bytes():
    # Derive a safe VMEM request from the chip instead of hardcoding 64 MiB
    # (that is the *entire* physical per-TC VMEM on v7x).  Leave ~25% headroom
    # for compiler-internal scratch; cap well below v5e/v6e's 128 MiB.
    cap = 128 * 1024 * 1024
    try:
        cap = int(getattr(pltpu.get_tpu_info(), "vmem_capacity_bytes", cap))
    except Exception:  # pragma: no cover - query unavailable off-TPU
        pass
    return int(min(cap * 3 // 4, 112 * 1024 * 1024))


# ----------------------------- Pallas kernels ------------------------------ #
def _glinear_kernel(x_ref, w_ref, b_ref, o_ref):
    # x_ref : (tm, gid)      token tile, columns of group g only
    # w_ref : (1, gid, god)  weight slice of group g
    # b_ref : (1, god)       bias slice of group g
    # o_ref : (tm, god)      lane-dense output tile for group g
    acc = jnp.dot(x_ref[...], w_ref[0], preferred_element_type=jnp.float32)
    o_ref[...] = (acc + b_ref[...]).astype(o_ref.dtype)


def _glinear_kernel_ktiled(x_ref, w_ref, b_ref, o_ref, acc_ref):
    # Same as above but group_in_dim is split over grid axis 2 (reduction,
    # "arbitrary", last) and accumulated in an f32 VMEM scratch tile.
    k = pl.program_id(2)

    @pl.when(k == 0)
    def _():
        acc_ref[...] = jnp.zeros_like(acc_ref)

    acc_ref[...] += jnp.dot(x_ref[...], w_ref[0],
                            preferred_element_type=jnp.float32)

    @pl.when(k == pl.num_programs(2) - 1)
    def _():
        o_ref[...] = (acc_ref[...] + b_ref[...]).astype(o_ref.dtype)


# --------------------------------- wrapper --------------------------------- #
def glinear(x, weight, bias=None, *, block_m=512, block_k=None,
            compute_dtype=None):
    """Pallas TPU forward of GLinear.

    x             : (bs, ..., in_features)
    weight        : (groups, group_in_dim, group_out_dim)
    bias          : (out_features,) or None
    block_m       : token-tile size (rounded to the dtype sublane tile)
    block_k       : optional tile over group_in_dim (None = whole group K)
    compute_dtype : optional MXU operand dtype (e.g. jnp.bfloat16 on v6e/v7x);
                    accumulation is always f32, output keeps x.dtype.
    returns       : (bs, -1, out_features)   -- matches the PyTorch module
    """
    groups, gid, god = weight.shape
    in_features = groups * gid
    out_features = groups * god
    assert x.shape[-1] == in_features
    # Lane alignment keeps every slice unmasked / relayout-free.
    # TODO(synk): support non-128-aligned group dims by padding weight/bias.
    assert gid % 128 == 0 and god % 128 == 0, "group dims must be multiples of 128"
    bs = x.shape[0]
    out_dtype = x.dtype

    # Flatten all leading dims into one token axis (fat MXU M-dim, amortized
    # per-step overhead over batch *and* sequence).
    N = int(np.prod(x.shape[:-1]))
    xf = x.reshape(N, in_features)

    if compute_dtype is not None:
        xf = xf.astype(compute_dtype)
        weight = weight.astype(compute_dtype)

    if bias is None:
        b2d = jnp.zeros((1, out_features), dtype=xf.dtype)
    else:
        b2d = bias.reshape(1, out_features).astype(xf.dtype)

    # Token tile: as big as block_m allows, rounded to the dtype sublane tile.
    sub = _sublane_tile(xf.dtype)
    tm = _round_up(min(block_m, _round_up(N, sub)), sub)
    Np = _round_up(N, tm)
    if Np != N:
        # Only hit when tm does not divide N (never in the common aligned case).
        xf = jnp.pad(xf, ((0, Np - N), (0, 0)))

    # K tile over group_in_dim.
    if block_k is None:
        tk = gid
        for cand in (2048, 1024, 512):            # bound VMEM for huge groups
            if gid > cand and gid % cand == 0:
                tk = cand
                break
    else:
        tk = min(block_k, gid)
    assert gid % tk == 0
    nk = gid // tk

    grid_m = Np // tm
    vmem_limit = _vmem_limit_bytes()

    if nk == 1:
        # Fused path: whole group K per step, no accumulator scratch.
        grid = (groups, grid_m)
        in_specs = [
            pl.BlockSpec((tm, gid), lambda g, m: (m, g)),          # tokens
            pl.BlockSpec((1, gid, god), lambda g, m: (g, 0, 0)),   # weight[g]
            pl.BlockSpec((1, god), lambda g, m: (0, g)),           # bias[g]
        ]
        out_specs = pl.BlockSpec((tm, god), lambda g, m: (m, g))
        scratch_shapes = []
        kern = _glinear_kernel
        dims = ("parallel", "parallel")
    else:
        # K-tiled path: reduction over gid chunks, f32 accumulator in VMEM.
        grid = (groups, grid_m, nk)
        in_specs = [
            pl.BlockSpec((tm, tk), lambda g, m, k: (m, g * nk + k)),
            pl.BlockSpec((1, tk, god), lambda g, m, k: (g, k, 0)),
            pl.BlockSpec((1, god), lambda g, m, k: (0, g)),
        ]
        out_specs = pl.BlockSpec((tm, god), lambda g, m, k: (m, g))
        scratch_shapes = [pltpu.VMEM((tm, god), jnp.float32)]
        kern = _glinear_kernel_ktiled
        dims = ("parallel", "parallel", "arbitrary")

    out = pl.pallas_call(
        kern,
        out_shape=jax.ShapeDtypeStruct((Np, out_features), out_dtype),
        grid_spec=pltpu.PrefetchScalarGridSpec(
            num_scalar_prefetch=0,
            grid=grid,
            in_specs=in_specs,
            out_specs=out_specs,
            scratch_shapes=scratch_shapes,
        ),
        compiler_params=pltpu.CompilerParams(
            dimension_semantics=dims,
            vmem_limit_bytes=vmem_limit,
        ),
    )(xf, weight, b2d)

    return out[:N].reshape(bs, -1, out_features)


# ------------------------ pure-JAX reference (check) ----------------------- #
def glinear_ref(x, weight, bias=None):
    bs = x.shape[0]
    groups, gid, god = weight.shape
    xg = x.reshape(-1, groups, gid)
    out = jnp.einsum('ngi,gio->ngo', xg, weight,
                     preferred_element_type=jnp.float32).astype(x.dtype)
    out = out.reshape(bs, -1, groups * god)
    if bias is not None:
        out = out + bias
    return out


# ----------------------------------- main ----------------------------------- #
if __name__ == "__main__":
    functools  # noqa: B018  (kept for symmetry with kernel variants)

    def run_case(key, bs, S, groups, gid, god, block_k=None):
        kx, kw, kb = jax.random.split(key, 3)
        in_features = groups * gid
        out_features = groups * god
        bound = 1.0 / np.sqrt(gid)
        x = jax.random.normal(kx, (bs, S, in_features), jnp.float32)
        w = jax.random.uniform(kw, (groups, gid, god), jnp.float32,
                               -bound, bound)
        b = jax.random.uniform(kb, (out_features,), jnp.float32,
                               -bound, bound)
        out = jax.block_until_ready(glinear(x, w, b, block_k=block_k))
        ref = glinear_ref(x, w, b)
        np.testing.assert_allclose(np.asarray(out), np.asarray(ref),
                                   rtol=1e-5, atol=1e-5)

    key = jax.random.PRNGKey(0)
    k1, k2 = jax.random.split(key)

    # Case 1: demo config (batch=2, seq=8, 256->256 features, 2 groups of 128)
    # -> fused per-group matmul path (nk == 1).
    run_case(k1, bs=2, S=8, groups=2, gid=128, god=128)

    # Case 2: wider group input dim with block_k=128 -> exercises the K-tiled
    # accumulator path (nk == 2) on small shapes.
    run_case(k2, bs=2, S=8, groups=2, gid=256, god=128, block_k=128)

    print("KERNEL_OK")
</pallas_src>

<mosaic_0001>
module attributes {stable_mosaic.version = 11 : i64} {
  func.func @_glinear_kernel(%arg0: i32, %arg1: i32, %arg2: memref<16x128xf32, #tpu.memory_space<vmem>>, %arg3: memref<1x128x128xf32, #tpu.memory_space<vmem>>, %arg4: memref<1x128xf32, #tpu.memory_space<vmem>>, %arg5: memref<16x128xf32, #tpu.memory_space<vmem>>) attributes {dimension_semantics = [#tpu.dimension_semantics<parallel>, #tpu.dimension_semantics<parallel>], iteration_bounds = array<i64: 2, 1>, scalar_prefetch = 0 : i64, scratch_operands = 0 : i64, tpu.core_type = #tpu.core_type<tc>, window_params = [{transform_indices = @transform_0, window_bounds = array<i64: 16, 128>}, {transform_indices = @transform_1, window_bounds = array<i64: 1, 128, 128>}, {transform_indices = @transform_2, window_bounds = array<i64: 1, 128>}, {transform_indices = @transform_3, window_bounds = array<i64: 16, 128>}]} {
    %c0 = arith.constant 0 : index
    %c0_0 = arith.constant 0 : index
    %0 = vector.load %arg2[%c0, %c0_0] : memref<16x128xf32, #tpu.memory_space<vmem>>, vector<16x128xf32>
    %c0_1 = arith.constant 0 : index
    %c0_2 = arith.constant 0 : index
    %c0_3 = arith.constant 0 : index
    %1 = vector.load %arg3[%c0_1, %c0_2, %c0_3] : memref<1x128x128xf32, #tpu.memory_space<vmem>>, vector<1x128x128xf32>
    %2 = vector.shape_cast %1 : vector<1x128x128xf32> to vector<128x128xf32>
    %cst = arith.constant dense<0.000000e+00> : vector<16x128xf32>
    %3 = tpu.matmul %0, %2, %cst {dimension_numbers = #tpu.dot_dimension_numbers<[1], [0], [0], [1], [0, 0, 1, 1], [], []>} : vector<16x128xf32>, vector<128x128xf32>, vector<16x128xf32> -> vector<16x128xf32>
    %c0_4 = arith.constant 0 : index
    %c0_5 = arith.constant 0 : index
    %4 = vector.load %arg4[%c0_4, %c0_5] : memref<1x128xf32, #tpu.memory_space<vmem>>, vector<1x128xf32>
    %5 = vector.broadcast %4 : vector<1x128xf32> to vector<16x128xf32>
    %6 = arith.addf %3, %5 : vector<16x128xf32>
    %c0_6 = arith.constant 0 : index
    %c0_7 = arith.constant 0 : index
    %7 = vector.load %arg5[%c0_6, %c0_7] : memref<16x128xf32, #tpu.memory_space<vmem>>, vector<16x128xf32>
    tpu.vector_store %arg5[%c0_6, %c0_7], %6 {strides = array<i32>} : memref<16x128xf32, #tpu.memory_space<vmem>>, vector<16x128xf32>,
    return
  }
  func.func @transform_0(%arg0: i32, %arg1: i32) -> (i32, i32) {
    %c0_i32 = arith.constant 0 : i32
    return %arg1, %arg0 : i32, i32
  }
  func.func @transform_1(%arg0: i32, %arg1: i32) -> (i32, i32, i32) {
    %c0_i32 = arith.constant 0 : i32
    %c0_i32_0 = arith.constant 0 : i32
    %c0_i32_1 = arith.constant 0 : i32
    return %arg0, %c0_i32, %c0_i32_0 : i32, i32, i32
  }
  func.func @transform_2(%arg0: i32, %arg1: i32) -> (i32, i32) {
    %c0_i32 = arith.constant 0 : i32
    %c0_i32_0 = arith.constant 0 : i32
    return %c0_i32, %arg0 : i32, i32
  }
  func.func @transform_3(%arg0: i32, %arg1: i32) -> (i32, i32) {
    %c0_i32 = arith.constant 0 : i32
    return %arg1, %arg0 : i32, i32
  }
}

</mosaic_0001>

<bundles_post_ra>
// kernel: tpu_custom_call.1
= control target key start
LH: loop header
LB: loop body
LE: loop exit
PB: predicated region body
PF: predicated region fallthrough
CT: control target
= control target key end

     0   :  { %s981_s0 = inlined_call_operand.hbm [shape: f32[16,256], index: 0, kind: input, shape index: {}]   ;;  %s982_s1 = inlined_call_operand.hbm [shape: f32[2,128,128], index: 1, kind: input, shape index: {}]   ;;  %s983_s2 = inlined_call_operand.hbm [shape: f32[1,256], index: 2, kind: input, shape index: {}]   ;;  %s984_s3 = inlined_call_operand.hbm [shape: f32[16,256], index: 3, kind: output, shape index: {}]  }
   0x1   :  { %991 = sst [smem:[#allocation18_spill]] %s982_s1 }
   0x2   :  { %8 = vsyncpa [#allocation3], 0 }
   0x3   :  { %10 = vsyncpa [#allocation3 + $0x1], 0 }
   0x4   :  { %11 = vsyncpa [#allocation6], 0 }
   0x5   :  { %13 = vsyncpa [#allocation6 + $0x1], 0 }
   0x6   :  { %14 = vsyncpa [#allocation4], 0 }
   0x7   :  { %16 = vsyncpa [#allocation4 + $0x1], 0  ;;  %s791_s12 = smov 0   ;;  %s793_s13 = smov 0  }
   0x8   :  { %s795_s14 = smov 0   ;;  %s797_s15 = smov 0  }
   0x9   :  { %s799_s16 = smov 0   ;;  %s801_s17 = smov 0  }
   0xa LB: > { %992 = sst [smem:[#allocation12_spill]] %s743_s12  ;;  %s822_s18 = sadd.s32 4294967295, %s763_s17   ;;  %s763_s17 = sphi %s801_s17, %s22_s17   ;;  %s759_s16 = sphi %s799_s16, %s1014_s16   ;;  %s755_s15 = sphi %s797_s15, %s1013_s15   ;;  %s751_s14 = sphi %s795_s14, %s1009_s14   ;;  %s747_s13 = sphi %s793_s13, %s1012_s13   ;;  %s743_s12 = sphi %s791_s12, %s1011_s12  }
   0xb   : > { %993 = sst [smem:[#allocation13_spill]] %s751_s14  ;;  %s475_s19 = sadd.s32 4294967294, %s763_s17  }
   0xc   : > { %994 = sst [smem:[#allocation14_spill]] %s763_s17  ;;  %s34_s20 = sadd.s32 1, %s759_s16 }
   0xd   : > { %s43_s21 = sadd.s32 1, %s751_s14  ;;  %p36_p0 = scmp.ge.s32.totalorder %s34_s20, 2 }
   0xe   : > { %p50_p1 = scmp.ne.s32.totalorder %s751_s14, %s747_s13  ;;  %p51_p2 = scmp.eq.s32.totalorder %s763_s17, 0 }
   0xf   : > { %p56_p3 = scmp.ne.s32.totalorder %s747_s13, %s743_s12  ;;  %s1016_s20 = smov (%p36_p0, %s34_s20), 0 }
  0x10   : > { %995 = sst [smem:[#allocation15_spill]] %s1016_s20  ;;  %p834_p4 = por %p51_p2, %p50_p1 }
  0x11   : > { %p57_p5 = scmp.eq.s32.totalorder %s822_s18, 0  ;;  %s39_s23 = ssub.s32 %s759_s16, %s1016_s20 }
  0x12   : > { %p134_p6 = scmp.eq.s32.totalorder %s822_s18, 1  ;;  %p41_p7 = scmp.eq.s32.totalorder %s39_s23, 0 }
  0x13   : > { %p842_p8 = por %p57_p5, %p56_p3  ;;  %p140_p10 = scmp.eq.s32.totalorder %s475_s19, 1 }
  0x14   : > { %p846_p9 = por %p134_p6, %p50_p1  ;;  %p477_p12 = scmp.ge.s32.totalorder %s763_s17, 2 }
  0x15   : > { %s851_s26 = scalar_select %p41_p7, %s751_s14, %s43_s21  }
  0x16   : > { %p853_p11 = por %p140_p10, %p56_p3  ;;  %p530_p13 = scmp.lt.s32.totalorder %s763_s17, 2 }
  0x17   : > { %999 = sst [smem:[#allocation16_spill]] %s851_s26  ;;  %s860_s28 = sand.u32 1, %s751_s14  }
  0x18   : > { %s1000_s27 = scalar_select %p853_p11, 1, 0 }
  0x19   : > { %p864_p0 = pnand %p530_p13, %p834_p4  ;;  %s184_s30 = sand.u32 1, %s763_s17  }
  0x1a   : > { %1001 = sst [smem:[#allocation17_spill]] %s1000_s27  ;;  %s480_s4 = sshll.u32 %s860_s28, 7 }
  0x1b   : > { %s491_s5 = sshll.u32 %s759_s16, 7  ;;  %s188_s6 = scalar_lea.vmem [#allocation5], %s480_s4 }
  0x1c   : > { %s196_s7 = sshll.u32 %s188_s6, 4  ;;  %s1003_s1 = sld [smem:[#allocation18_spill]]  ;;  %s197_s7 = int_to_ptr.vmem [resolvable:$true] %s196_s7 }
  0x1d   : > { %p483_p1 = scmp.ge.s32.totalorder %s763_s17, 1  ;;  %p221_p2 = scmp.lt.s32.totalorder %s763_s17, 3 }
  0x1e   : > { %s185_s19 = scalar_lea.sflag [#allocation6], %s184_s30  ;;  %s765_s21 = smov 128  }
  0x1f   : > { %s766_s22 = smov 8   ;;  %p878_p3 = pnand %p483_p1, %p221_p2 }
  0x20   : > { %s478_s4 = sshll.u32 %s860_s28, 4  ;;  %s161_s20 = scalar_lea.sflag [#allocation3], %s860_s28 }
  0x21   : > { %s767_s26 = smov 256   ;;  %s212_s14 = scalar_lea.hbm %s983_s2, %s759_s16 }
  0x22   : > { %s193_s10 = scalar_lea.hbm %s1003_s1, %s491_s5  ;;  %s479_s5 = sshll.u32 %s759_s16, 3 }
  0x23   : > { %s194_s11 = sshll.u32 %s193_s10, 4  ;;  %s171_s9 = scalar_lea.hbm %s981_s0, %s479_s5  ;;  %s195_s11 = int_to_ptr.hbm [resolvable:$true] %s194_s11 }
  0x24   : > { %522 = dma.hbm_to_vmem [thread:$0]  (!%p864_p0), %s195_s11, 2048, %s197_s7, %s185_s19, %s765_s21, %s765_s21, %s766_s22  }
  0x25   : > { %s172_s10 = sshll.u32 %s171_s9, 4  ;;  %s164_s1 = scalar_lea.vmem [#allocation2], %s478_s4  ;;  %s173_s10 = int_to_ptr.hbm [resolvable:$true] %s172_s10 }
  0x26   : > { %s174_s30 = sshll.u32 %s164_s1, 4  ;;  %s209_s17 = scalar_lea.vmem [#allocation7], %s860_s28  ;;  %s175_s30 = int_to_ptr.vmem [resolvable:$true] %s174_s30 }
  0x27   : > { %519 = dma.hbm_to_vmem [thread:$0]  (!%p864_p0), %s173_s10, 256, %s175_s30, %s161_s20, %s767_s26, %s765_s21, %s766_s22  }
  0x28   : > { %s216_s27 = sshll.u32 %s209_s17, 4  ;;  %s214_s12 = sshll.u32 %s212_s14, 4  ;;  %s217_s27 = int_to_ptr.vmem [resolvable:$true] %s216_s27  ;;  %s215_s12 = int_to_ptr.hbm [resolvable:$true] %s214_s12 }
  0x29   : > { %525 = dma.hbm_to_vmem [thread:$0]  (!%p864_p0), %s215_s12, 16, %s217_s27, %s185_s19  }
  0x2a   : > { %225 = sbr.rel (%p878_p3) target bundleno = 217 (0xd9), region = 32  ;;  %s900_s1 = sand.u32 (!%p878_p3), 1, %s747_s13  }
  0x2b   : > { %s484_s20 = sshll.u32 (!%p878_p3), %s900_s1, 4  ;;  %s228_s26 = scalar_lea.sflag (!%p878_p3), [#allocation3], %s900_s1 }
  0x2c   : > { %s906_s28 = scalar_lea.vmem (!%p878_p3), [#allocation2], %s484_s20 }
  0x2f   : > { %730 = dma.done.wait (%p842_p8), %s228_s26, 256  }
  0x30   : > { %732 = vsyncadd (%p842_p8), %s228_s26, 4294967040  ;;  %s237_s12 = sand.u32 1, %s822_s18   ;;  %s485_s14 = sshll.u32 %s900_s1, 7 }
  0x31   : > { %s238_s17 = scalar_lea.sflag [#allocation6], %s237_s12  ;;  %s914_s27 = scalar_lea.vmem [#allocation5], %s485_s14 }
  0x32   : > { %734 = dma.done.wait (%p842_p8), %s238_s17, 2064  }
  0x33   : > { %736 = vsyncadd (%p842_p8), %s238_s17, 4294965232  ;;  %v302_v0 = vld [vmem:[%s914_s27 + $0x78] sm:$0xff]  ;;  %v301_v1 = vld [vmem:[%s914_s27 + $0x70] sm:$0xff]  ;;  %s250_s18 = scalar_lea.vmem [#allocation7], %s900_s1  ;;  %s488_s24 = sshll.u32 %s755_s15, 3 }
  0x34   : > { %307 = vmatpush.msra.mxu0 %v302_v0  ;;  %492 = vmatpush.msra.mxu1 %v302_v0  ;;  %v300_v2 = vld [vmem:[%s914_s27 + $0x68] sm:$0xff]  ;;  %v299_v3 = vld [vmem:[%s914_s27 + $0x60] sm:$0xff]  ;;  %v298_v4 = vld [vmem:[%s914_s27 + $0x58] sm:$0xff]  ;;  %s346_s21 = scalar_lea.hbm %s984_s3, %s488_s24  ;;  %s282_s22 = scalar_lea.vmem [#allocation8], %s484_s20 }
  0x35   : > { %v297_v5 = vld [vmem:[%s914_s27 + $0x50] sm:$0xff]  ;;  %v296_v6 = vld [vmem:[%s914_s27 + $0x48] sm:$0xff]  ;;  %v295_v7 = vld [vmem:[%s914_s27 + $0x40] sm:$0xff]  ;;  %s347_s23 = sshll.u32 %s282_s22, 4  ;;  %s349_s4 = sshll.u32 %s346_s21, 4  ;;  %s348_s23 = int_to_ptr.vmem [resolvable:$true] %s347_s23  ;;  %s350_s4 = int_to_ptr.hbm [resolvable:$true] %s349_s4 }
  0x36   : > { %308 = vmatpush.msra.mxu0 %v301_v1  ;;  %493 = vmatpush.msra.mxu1 %v301_v1  ;;  %v294_v8 = vld [vmem:[%s914_s27 + $0x38] sm:$0xff]  ;;  %v293_v9 = vld [vmem:[%s914_s27 + $0x30] sm:$0xff]  ;;  %v292_v10 = vld [vmem:[%s914_s27 + $0x28] sm:$0xff]  ;;  %s333_s15 = scalar_lea.sflag [#allocation4], %s900_s1  ;;  %s691_s5 = sshra.s32 %s350_s4, 4  ;;  %s692_s5 = int_to_ptr.hbm [resolvable:$true] %s691_s5 }
  0x37   : > { %v291_v11 = vld [vmem:[%s914_s27 + $0x20] sm:$0xff]  ;;  %v290_v12 = vld [vmem:[%s914_s27 + $0x18] sm:$0xff]  ;;  %v289_v13 = vld [vmem:[%s914_s27 + $0x10] sm:$0xff]  ;;  %s693_s6 = scalar_lea.hbm %s692_s5, 16  ;;  %s697_s10 = scalar_lea.hbm %s984_s3, 32 }
  0x38   : > { %309 = vmatpush.msra.mxu0 %v300_v2  ;;  %494 = vmatpush.msra.mxu1 %v300_v2  ;;  %v288_v14 = vld [vmem:[%s914_s27 + $0x8] sm:$0xff]  ;;  %v287_v15 = vld [vmem:[%s914_s27] sm:$0xff]  ;;  %p694_p4 = scmp.ne.s32.totalorder %s692_s5, %s693_s6  ;;  %p698_p7 = scmp.lt.s32.totalorder %s692_s5, %s984_s3 }
  0x39   : > { %v285_v16 = vld [vmem:[%s906_s28] sm:$0xff]  ;;  %v286_v17 = vld [vmem:[%s906_s28 + $0x8] sm:$0xff]  ;;  %p699_p8 = scmp.lt.s32.totalorder %s697_s10, %s693_s6 }
  0x3a   : > { %310 = vmatpush.msra.mxu0 %v299_v3  ;;  %495 = vmatpush.msra.mxu1 %v299_v3  ;;  %v586_v18 = vld [vmem:[%s250_s18] ss:$0 sm:$0xff]  ;;  %p695_p5 = pnand %p694_p4, %p846_p9 }
  0x3b   : > { %p700_p10 = por %p699_p8, %p698_p7 }
  0x3c   : > { %311 = vmatpush.msra.mxu0 %v298_v4  ;;  %496 = vmatpush.msra.mxu1 %v298_v4  ;;  %p696_p6 = pneg %p695_p5 }
  0x3e   : > { %312 = vmatpush.msra.mxu0 %v297_v5  ;;  %497 = vmatpush.msra.mxu1 %v297_v5  ;;  %p701_p13 = pnand %p700_p10, %p696_p6 }
  0x40   : > { %313 = vmatpush.msra.mxu0 %v296_v6  ;;  %498 = vmatpush.msra.mxu1 %v296_v6 }
  0x42   : > { %314 = vmatpush.msra.mxu0 %v295_v7  ;;  %499 = vmatpush.msra.mxu1 %v295_v7 }
  0x44   : > { %315 = vmatpush.msra.mxu0 %v294_v8  ;;  %500 = vmatpush.msra.mxu1 %v294_v8 }
  0x46   : > { %316 = vmatpush.msra.mxu0 %v293_v9  ;;  %501 = vmatpush.msra.mxu1 %v293_v9 }
  0x48   : > { %317 = vmatpush.msra.mxu0 %v292_v10  ;;  %502 = vmatpush.msra.mxu1 %v292_v10 }
  0x4a   : > { %318 = vmatpush.msra.mxu0 %v291_v11  ;;  %503 = vmatpush.msra.mxu1 %v291_v11 }
  0x4c   : > { %319 = vmatpush.msra.mxu0 %v290_v12  ;;  %504 = vmatpush.msra.mxu1 %v290_v12 }
  0x4e   : > { %320 = vmatpush.msra.mxu0 %v289_v13  ;;  %505 = vmatpush.msra.mxu1 %v289_v13 }
  0x50   : > { %321 = vmatpush.msra.mxu0 %v288_v14  ;;  %506 = vmatpush.msra.mxu1 %v288_v14 }
  0x52   : > { %322 = vmatpush.msra.mxu0 %v287_v15  ;;  %507 = vmatpush.msra.mxu1 %v287_v15 }
  0x53   : > { %323 = vmatmul.f32.vlgmr.msra.gmra.mxu0 %v285_v16  ;;  %326 = vmatmul.f32.vlgmr.msra.gmra.mxu1 %v286_v17 }
  0xd0   : > { %v324_v19 = vpop.f32.mrf.mxu0  ;;  %v327_v20 = vpop.f32.mrf.mxu1 }
  0xd1   : > { %v325_v21 = vadd.f32 %v586_v18, %v324_v19  ;;  %v328_v22 = vadd.f32 %v586_v18, %v327_v20 }
  0xd3   : > { %330 = vst [vmem:[%s282_s22] sm:$0xff] %v325_v21 }
  0xd4   : > { %331 = vst [vmem:[%s282_s22 + $0x8] sm:$0xff] %v328_v22 }
  0xd5   : > { %704 = shalt.err (!%p701_p13)
}
  0xd6   : > { %s768_s11 = smov 128   ;;  %s769_s1 = smov 256  }
  0xd7   : > { %s770_s20 = smov 8  }
  0xd8   : > { %514 = dma.vmem_to_hbm [thread:$0]  (%p846_p9), %s348_s23, 256, %s350_s4, %s333_s15, %s768_s11, %s769_s1, %s770_s20  }
  0xd9 PF: > { %s1005_s26 = sld [smem:[#allocation12_spill]]  ;;  %p527_p0 = pnand %p477_p12, %p853_p11 }
  0xda   : > { %s1007_s12 = sld [smem:[#allocation14_spill]] }
  0xdb   : > { %p528_p1 = pneg %p527_p0 }
  0xdf   : > { %s364_s14 = sand.u32 1, %s1005_s26  }
  0xe0   : > { %s365_s17 = scalar_lea.sflag [#allocation4], %s364_s14 }
  0xe1   : > { %738 = dma.done.wait (%p528_p1), %s365_s17, 256  }
  0xe2   : > { %740 = vsyncadd (%p528_p1), %s365_s17, 4294967040  ;;  %s22_s17 = sadd.s32 1, %s1007_s12   ;;  %s1008_s27 = sld [smem:[#allocation13_spill]] }
  0xe3   : > { %p19_p2 = scmp.ge.s32.totalorder %s22_s17, 4   ;;  %s1009_s14 = sld [smem:[#allocation16_spill]] }
  0xe4   : > { %s1010_s25 = sld [smem:[#allocation15_spill]]  ;;  %s1011_s12 = smov %s747_s13 }
  0xe5   : > { %s1013_s15 = smov %s759_s16 }
  0xe6   :  { %21 = sbr.rel (!%p19_p2) target bundleno = 10 (0xa), region = 101 }
  0xe8   : > { %s1012_s13 = smov %s1008_s27 }
  0xea   : > { %s1014_s16 = smov %s1010_s25 }
  0xeb   :  { %371 = vsyncpa [#allocation3], 1 }
  0xec   :  { %373 = vsyncpa [#allocation3 + $0x1], 1 }
  0xed   :  { %374 = vsyncpa [#allocation6], 1 }
  0xee   :  { %376 = vsyncpa [#allocation6 + $0x1], 1 }
  0xef   :  { %377 = vsyncpa [#allocation4], 1 }
  0xf0   :  { %379 = vsyncpa [#allocation4 + $0x1], 1 }

</bundles_post_ra>
